<compile_context>
chip_gen: v5e
topology: v5e:2x2
jax: 0.10.0
libtpu: 0.0.40
codegen_flags: <defaults>
</compile_context>

<pallas_src>
import functools

import jax
import jax.numpy as jnp
from jax import lax
from jax.experimental import pallas as pl
from jax.experimental.pallas import tpu as pltpu


_NEG_LARGE = -1e30  # effectively -inf for padded class lanes (finite => no NaN risk)


def _round_up(n, m):
    return ((n + m - 1) // m) * m


def _masked_logits(x_ref, w_ref, b_ref, num_classes):
    # x_ref: (TB, D), w_ref: (C_pad, D) in PyTorch (out, in) layout -> contract on D.
    logits = lax.dot_general(
        x_ref[...], w_ref[...],
        dimension_numbers=(((1,), (1,)), ((), ())),
        preferred_element_type=jnp.float32,
    ) + b_ref[...]
    lane = lax.broadcasted_iota(jnp.int32, logits.shape, 1)
    # Padded class lanes -> very negative so exp() underflows to 0 in softmax / LSE.
    return jnp.where(lane < num_classes, logits, _NEG_LARGE)


# ---------------------------------------------------------------------------
# Kernel 1: inference path  ->  softmax(linear(x), axis=1)
# ---------------------------------------------------------------------------
def predict_kernel(x_ref, w_ref, b_ref, out_ref, *, num_classes):
    logits = _masked_logits(x_ref, w_ref, b_ref, num_classes)
    m = logits.max(axis=-1, keepdims=True)
    e = jnp.exp(logits - m)
    denom = e.sum(axis=-1, keepdims=True)
    out_ref[...] = (e * pl.reciprocal(denom, approx=True)).astype(out_ref.dtype)


# ---------------------------------------------------------------------------
# Kernel 2: training path  ->  cross_entropy(linear(x), y)  (mean reduction)
# Labels arrive as raw int32 (TB, 1); one-hot mask is built in-kernel.
# Scalar loss is accumulated across batch-tile grid steps in the resident
# (1, 1) output block (pl.when init / finalize).
# ---------------------------------------------------------------------------
def loss_kernel(x_ref, w_ref, b_ref, lbl_ref, loss_ref, *,
                num_classes, batch, tile_b):
    i = pl.program_id(0)

    @pl.when(i == 0)
    def _():
        loss_ref[...] = jnp.zeros_like(loss_ref)

    logits = _masked_logits(x_ref, w_ref, b_ref, num_classes)
    m = logits.max(axis=-1, keepdims=True)
    lse = m + jnp.log(jnp.exp(logits - m).sum(axis=-1, keepdims=True))   # (TB, 1)

    lane = lax.broadcasted_iota(jnp.int32, logits.shape, 1)
    onehot = lane == lbl_ref[...]                                        # (TB, C_pad)
    true_logit = jnp.sum(jnp.where(onehot, logits, 0.0),
                         axis=-1, keepdims=True)                         # (TB, 1)

    # Mask out rows that are pure batch padding.
    row = i * tile_b + lax.broadcasted_iota(jnp.int32, (tile_b, 1), 0)
    valid = row < batch
    per_example = jnp.where(valid, lse - true_logit, 0.0)                # (TB, 1)

    loss_ref[...] = loss_ref[...] + jnp.sum(per_example)

    @pl.when(i == pl.num_programs(0) - 1)
    def _():
        loss_ref[...] = loss_ref[...] / jnp.float32(batch)


# ---------------------------------------------------------------------------
# Wrappers (jitted so padding glue fuses with adjacent ops)
# ---------------------------------------------------------------------------
def _tile_cfg(batch, tile_b):
    tb = tile_b if tile_b is not None else min(256, _round_up(batch, 8))
    b_pad = _round_up(batch, tb)
    return tb, b_pad


def _pad_params(w, b, c_pad):
    c, d = w.shape
    w_p = jnp.zeros((c_pad, d), w.dtype).at[:c, :].set(w)
    b_p = jnp.zeros((1, c_pad), b.dtype).at[0, :c].set(b)
    return w_p, b_p


@functools.partial(jax.jit, static_argnums=(3,))
def _forward_predict(x, w, b, tile_b):
    B, D = x.shape
    C = w.shape[0]
    C_pad = _round_up(C, 128)
    TB, B_pad = _tile_cfg(B, tile_b)
    grid_b = B_pad // TB

    x_p = jnp.zeros((B_pad, D), x.dtype).at[:B].set(x)
    w_p, b_p = _pad_params(w, b, C_pad)

    kernel = functools.partial(predict_kernel, num_classes=C)
    probs = pl.pallas_call(
        kernel,
        out_shape=jax.ShapeDtypeStruct((B_pad, C_pad), jnp.float32),
        grid_spec=pltpu.PrefetchScalarGridSpec(
            num_scalar_prefetch=0,
            grid=(grid_b,),
            in_specs=[
                pl.BlockSpec((TB, D), lambda i: (i, 0)),       # x tile (pipelined)
                pl.BlockSpec((C_pad, D), lambda i: (0, 0)),    # weight (resident)
                pl.BlockSpec((1, C_pad), lambda i: (0, 0)),    # bias (resident)
            ],
            out_specs=pl.BlockSpec((TB, C_pad), lambda i: (i, 0)),
        ),
        compiler_params=pltpu.CompilerParams(
            dimension_semantics=("parallel",),
            vmem_limit_bytes=32 * 1024 * 1024,
        ),
    )(x_p, w_p, b_p)
    return probs[:B, :C]


@functools.partial(jax.jit, static_argnums=(4,))
def _forward_loss(x, w, b, y, tile_b):
    B, D = x.shape
    C = w.shape[0]
    C_pad = _round_up(C, 128)
    TB, B_pad = _tile_cfg(B, tile_b)
    grid_b = B_pad // TB

    x_p = jnp.zeros((B_pad, D), x.dtype).at[:B].set(x)
    w_p, b_p = _pad_params(w, b, C_pad)
    lbl = jnp.zeros((B_pad, 1), jnp.int32).at[:B, 0].set(y.astype(jnp.int32))

    kernel = functools.partial(loss_kernel, num_classes=C, batch=B, tile_b=TB)
    loss = pl.pallas_call(
        kernel,
        out_shape=jax.ShapeDtypeStruct((1, 1), jnp.float32),
        grid_spec=pltpu.PrefetchScalarGridSpec(
            num_scalar_prefetch=0,
            grid=(grid_b,),
            in_specs=[
                pl.BlockSpec((TB, D), lambda i: (i, 0)),       # x tile (pipelined)
                pl.BlockSpec((C_pad, D), lambda i: (0, 0)),    # weight (resident)
                pl.BlockSpec((1, C_pad), lambda i: (0, 0)),    # bias (resident)
                pl.BlockSpec((TB, 1), lambda i: (i, 0)),       # int32 labels
            ],
            out_specs=pl.BlockSpec((1, 1), lambda i: (0, 0)),  # resident accumulator
        ),
        compiler_params=pltpu.CompilerParams(
            dimension_semantics=("arbitrary",),
            vmem_limit_bytes=32 * 1024 * 1024,
        ),
    )(x_p, w_p, b_p, lbl)
    return loss[0, 0]


def torch_model_forward(x, w, b, y=None, *, tile_b=None):
    """Mirrors TorchModel.forward: returns softmax probs if y is None, else CE loss.

    x: (B, D) f32; w: (C, D) f32 (PyTorch nn.Linear layout); b: (C,) f32;
    y: optional (B,) int32 class labels.  NOTE: for large D/C on v6e/v7x, cast
    x/w to bf16 before calling (MXU + HBM win); kept f32 here for the toy shapes.
    """
    if y is None:
        return _forward_predict(x, w, b, tile_b)
    return _forward_loss(x, w, b, y, tile_b)


if __name__ == "__main__":
    B, D, C = 8, 32, 5          # batch, input_size, output_size

    key = jax.random.PRNGKey(0)
    kx, kw, kb, ky = jax.random.split(key, 4)
    x = jax.random.normal(kx, (B, D), dtype=jnp.float32)
    w = jax.random.normal(kw, (C, D), dtype=jnp.float32) * 0.1   # synthetic init
    b = jax.random.normal(kb, (C,), dtype=jnp.float32) * 0.1
    y = jax.random.randint(ky, (B,), 0, C, dtype=jnp.int32)

    # Inference path: softmax(linear(x), dim=1)
    probs = jax.block_until_ready(torch_model_forward(x, w, b))
    # Training path: cross_entropy(linear(x), y)
    loss = jax.block_until_ready(torch_model_forward(x, w, b, y))

    # Pure-JAX reference (high-precision matmul so the check isolates kernel error)
    logits_ref = lax.dot_general(x, w, (((1,), (1,)), ((), ())),
                                 precision=lax.Precision.HIGHEST) + b
    probs_ref = jax.nn.softmax(logits_ref, axis=1)
    lse_ref = jax.nn.logsumexp(logits_ref, axis=1)
    loss_ref = jnp.mean(lse_ref - logits_ref[jnp.arange(B), y])

    assert probs.shape == (B, C)
    # approx=True reciprocal -> slightly looser tolerance on probs
    assert jnp.allclose(probs, probs_ref, atol=2e-3), float(jnp.max(jnp.abs(probs - probs_ref)))
    assert jnp.allclose(loss, loss_ref, atol=1e-4, rtol=1e-4), (float(loss), float(loss_ref))

    # Second check: exercise batch padding + multi-step grid accumulation (grid=3).
    B2 = 20
    x2 = jax.random.normal(jax.random.PRNGKey(1), (B2, D), dtype=jnp.float32)
    y2 = jax.random.randint(jax.random.PRNGKey(2), (B2,), 0, C, dtype=jnp.int32)
    probs2 = jax.block_until_ready(torch_model_forward(x2, w, b, tile_b=8))
    loss2 = jax.block_until_ready(torch_model_forward(x2, w, b, y2, tile_b=8))

    logits2 = lax.dot_general(x2, w, (((1,), (1,)), ((), ())),
                              precision=lax.Precision.HIGHEST) + b
    probs2_ref = jax.nn.softmax(logits2, axis=1)
    loss2_ref = jnp.mean(jax.nn.logsumexp(logits2, axis=1)
                         - logits2[jnp.arange(B2), y2])
    assert jnp.allclose(probs2, probs2_ref, atol=2e-3)
    assert jnp.allclose(loss2, loss2_ref, atol=1e-4, rtol=1e-4)

    print("KERNEL_OK")
</pallas_src>

<mosaic_0001>
module attributes {stable_mosaic.version = 11 : i64} {
  func.func @predict_kernel(%arg0: i32, %arg1: memref<8x32xf32, #tpu.memory_space<vmem>>, %arg2: memref<128x32xf32, #tpu.memory_space<vmem>>, %arg3: memref<1x128xf32, #tpu.memory_space<vmem>>, %arg4: memref<8x128xf32, #tpu.memory_space<vmem>>) attributes {dimension_semantics = [#tpu.dimension_semantics<parallel>], iteration_bounds = array<i64: 1>, scalar_prefetch = 0 : i64, scratch_operands = 0 : i64, tpu.core_type = #tpu.core_type<tc>, window_params = [{transform_indices = @transform_0, window_bounds = array<i64: 8, 32>}, {pipeline_mode = #tpu.pipeline_mode<synchronous>, transform_indices = @transform_1, window_bounds = array<i64: 128, 32>}, {pipeline_mode = #tpu.pipeline_mode<synchronous>, transform_indices = @transform_2, window_bounds = array<i64: 1, 128>}, {transform_indices = @transform_3, window_bounds = array<i64: 8, 128>}]} {
    %c0 = arith.constant 0 : index
    %c0_0 = arith.constant 0 : index
    %0 = vector.load %arg1[%c0, %c0_0] : memref<8x32xf32, #tpu.memory_space<vmem>>, vector<8x32xf32>
    %c0_1 = arith.constant 0 : index
    %c0_2 = arith.constant 0 : index
    %1 = vector.load %arg2[%c0_1, %c0_2] : memref<128x32xf32, #tpu.memory_space<vmem>>, vector<128x32xf32>
    %cst = arith.constant dense<0.000000e+00> : vector<8x128xf32>
    %2 = tpu.matmul %0, %1, %cst {dimension_numbers = #tpu.dot_dimension_numbers<[1], [1], [0], [0], [0, 0, 1, 0], [], []>} : vector<8x32xf32>, vector<128x32xf32>, vector<8x128xf32> -> vector<8x128xf32>
    %c0_3 = arith.constant 0 : index
    %c0_4 = arith.constant 0 : index
    %3 = vector.load %arg3[%c0_3, %c0_4] : memref<1x128xf32, #tpu.memory_space<vmem>>, vector<1x128xf32>
    %4 = vector.broadcast %3 : vector<1x128xf32> to vector<8x128xf32>
    %5 = arith.addf %2, %4 : vector<8x128xf32>
    %6 = tpu.iota {dimensions = array<i32: 1>} : vector<8x128xi32>
    %c5_i32 = arith.constant 5 : i32
    %7 = vector.broadcast %c5_i32 : i32 to vector<8x128xi32>
    %8 = arith.cmpi slt, %6, %7 : vector<8x128xi32>
    %cst_5 = arith.constant -1.000000e+30 : f32
    %9 = vector.broadcast %cst_5 : f32 to vector<8x128xf32>
    %10 = arith.select %8, %5, %9 : vector<8x128xi1>, vector<8x128xf32>
    %cst_6 = arith.constant dense<0xFF800000> : vector<8xf32>
    %11 = vector.multi_reduction <maximumf>, %10, %cst_6 [1] : vector<8x128xf32> to vector<8xf32>
    %12 = vector.shape_cast %11 : vector<8xf32> to vector<8x1xf32>
    %13 = vector.broadcast %12 : vector<8x1xf32> to vector<8x128xf32>
    %14 = arith.subf %10, %13 : vector<8x128xf32>
    %15 = math.exp %14 : vector<8x128xf32>
    %cst_7 = arith.constant dense<0.000000e+00> : vector<8xf32>
    %16 = vector.multi_reduction <add>, %15, %cst_7 [1] : vector<8x128xf32> to vector<8xf32>
    %17 = vector.shape_cast %16 : vector<8xf32> to vector<8x1xf32>
    %18 = tpu.reciprocal %17 {approx = true} : vector<8x1xf32> -> vector<8x1xf32>
    %19 = vector.broadcast %18 : vector<8x1xf32> to vector<8x128xf32>
    %20 = arith.mulf %15, %19 : vector<8x128xf32>
    %c0_8 = arith.constant 0 : index
    %c0_9 = arith.constant 0 : index
    %21 = vector.load %arg4[%c0_8, %c0_9] : memref<8x128xf32, #tpu.memory_space<vmem>>, vector<8x128xf32>
    tpu.vector_store %arg4[%c0_8, %c0_9], %20 {strides = array<i32>} : memref<8x128xf32, #tpu.memory_space<vmem>>, vector<8x128xf32>,
    return
  }
  func.func @transform_0(%arg0: i32) -> (i32, i32) {
    %c0_i32 = arith.constant 0 : i32
    %c0_i32_0 = arith.constant 0 : i32
    return %arg0, %c0_i32 : i32, i32
  }
  func.func @transform_1(%arg0: i32) -> (i32, i32) {
    %c0_i32 = arith.constant 0 : i32
    %c0_i32_0 = arith.constant 0 : i32
    %c0_i32_1 = arith.constant 0 : i32
    return %c0_i32, %c0_i32_0 : i32, i32
  }
  func.func @transform_2(%arg0: i32) -> (i32, i32) {
    %c0_i32 = arith.constant 0 : i32
    %c0_i32_0 = arith.constant 0 : i32
    %c0_i32_1 = arith.constant 0 : i32
    return %c0_i32, %c0_i32_0 : i32, i32
  }
  func.func @transform_3(%arg0: i32) -> (i32, i32) {
    %c0_i32 = arith.constant 0 : i32
    %c0_i32_0 = arith.constant 0 : i32
    return %arg0, %c0_i32 : i32, i32
  }
}

</mosaic_0001>

<bundles_post_ra>
// kernel: _forward_predict.1
= control target key start
LH: loop header
LB: loop body
LE: loop exit
PB: predicated region body
PF: predicated region fallthrough
CT: control target
= control target key end

     0   :  { %vm36_vm0 = vcmask 261120   ;;  %s282_s0 = inlined_call_operand.vmem [shape: f32[8,32], index: 0, kind: input, shape index: {}]   ;;  %s283_s1 = inlined_call_operand.vmem [shape: f32[128,32], index: 1, kind: input, shape index: {}]   ;;  %s284_s2 = inlined_call_operand.vmem [shape: f32[1,128], index: 2, kind: input, shape index: {}]   ;;  %s285_s3 = inlined_call_operand.hbm [shape: f32[8,128], index: 3, kind: output, shape index: {}]  }
   0x1   :  { %v31_v0 = vld [vmem:[%s283_s1 + $0x78] sm:$0xff]  ;;  %v30_v1 = vld [vmem:[%s283_s1 + $0x70] sm:$0xff] }
   0x2   :  { %138 = vmatpush.xpose.msk.msra.mxu0 %vm36_vm0, %v31_v0 }
   0x3   :  { %8 = vsyncpa [#allocation3], 0  ;;  %v29_v2 = vld [vmem:[%s283_s1 + $0x68] sm:$0xff]  ;;  %v28_v3 = vld [vmem:[%s283_s1 + $0x60] sm:$0xff]  ;;  %v108_v17 = vlaneseq  ;;  %s129_s23 = sshll.u32 %s285_s3, 4  ;;  %s130_s23 = int_to_ptr.hbm [resolvable:$true] %s129_s23 }
   0x4   :  { %v27_v4 = vld [vmem:[%s283_s1 + $0x58] sm:$0xff]  ;;  %v26_v5 = vld [vmem:[%s283_s1 + $0x50] sm:$0xff]  ;;  %v25_v6 = vld [vmem:[%s283_s1 + $0x48] sm:$0xff] }
   0x5   :  { %v24_v7 = vld [vmem:[%s283_s1 + $0x40] sm:$0xff]  ;;  %v23_v8 = vld [vmem:[%s283_s1 + $0x38] sm:$0xff]  ;;  %v22_v9 = vld [vmem:[%s283_s1 + $0x30] sm:$0xff]  ;;  %v109_v18 = vand.u32 127, %v108_v17 }
   0x6   :  { %139 = vmatpush.xpose.msk.msra.mxu0 %vm36_vm0, %v30_v1  ;;  %v21_v10 = vld [vmem:[%s283_s1 + $0x28] sm:$0xff]  ;;  %v20_v11 = vld [vmem:[%s283_s1 + $0x20] sm:$0xff]  ;;  %v19_v12 = vld [vmem:[%s283_s1 + $0x18] sm:$0xff] }
   0x7   :  { %v18_v13 = vld [vmem:[%s283_s1 + $0x10] sm:$0xff]  ;;  %v17_v14 = vld [vmem:[%s283_s1 + $0x8] sm:$0xff]  ;;  %v16_v15 = vld [vmem:[%s283_s1] sm:$0xff]  ;;  %vm110_vm1 = vcmp.lt.s32.totalorder %v109_v18, 5 }
   0x8   :  { %v15_v16 = vld [vmem:[%s282_s0] sm:$0xff]  ;;  %s187_s0 = smov [#allocation2]  }
   0x9   :  { %v156_v19 = vld [vmem:[%s284_s2] ss:$0 sm:$0xff]  ;;  %s127_s1 = sshll.u32 %s187_s0, 4  ;;  %s128_s1 = int_to_ptr.vmem [resolvable:$true] %s127_s1 }
   0xa   :  { %140 = vmatpush.xpose.msk.msra.mxu0 %vm36_vm0, %v29_v2 }
   0xe   :  { %141 = vmatpush.xpose.msk.msra.mxu0 %vm36_vm0, %v28_v3 }
  0x12   :  { %142 = vmatpush.xpose.msk.msra.mxu0 %vm36_vm0, %v27_v4 }
  0x16   :  { %143 = vmatpush.xpose.msk.msra.mxu0 %vm36_vm0, %v26_v5 }
  0x1a   :  { %144 = vmatpush.xpose.msk.msra.mxu0 %vm36_vm0, %v25_v6 }
  0x1e   :  { %145 = vmatpush.xpose.msk.msra.mxu0 %vm36_vm0, %v24_v7 }
  0x22   :  { %146 = vmatpush.xpose.msk.msra.mxu0 %vm36_vm0, %v23_v8 }
  0x26   :  { %147 = vmatpush.xpose.msk.msra.mxu0 %vm36_vm0, %v22_v9 }
  0x2a   :  { %148 = vmatpush.xpose.msk.msra.mxu0 %vm36_vm0, %v21_v10 }
  0x2e   :  { %149 = vmatpush.xpose.msk.msra.mxu0 %vm36_vm0, %v20_v11 }
  0x32   :  { %150 = vmatpush.xpose.msk.msra.mxu0 %vm36_vm0, %v19_v12 }
  0x36   :  { %151 = vmatpush.xpose.msk.msra.mxu0 %vm36_vm0, %v18_v13 }
  0x3a   :  { %152 = vmatpush.xpose.msk.msra.mxu0 %vm36_vm0, %v17_v14 }
  0x3e   :  { %153 = vmatpush.xpose.msk.msra.mxu0 %vm36_vm0, %v16_v15 }
  0x41   :  { %154 = vmatmul.msk.f32.vlgmr.msra.gmra.mxu0 %vm36_vm0, %v15_v16 }
  0xbe   :  { %v105_v20 = vpop.f32.mrf.mxu0 }
  0xbf   :  { %v106_v21 = vadd.f32 %v156_v19, %v105_v20 }
  0xc1   :  { %v111_v22 = vsel %vm110_vm1, %v106_v21, -1e+30 }
  0xc2   :  { %112 = vmax.xlane.f32.xlu0 %v111_v22 }
 0x135   :  { %v113_v23 = vpop.xlane.xlu0 %112 }
 0x136   :  { %v114_v24 = vsub.f32 %v111_v22, %v113_v23 }
 0x138   :  { %v115_v25 = vmul.f32 1.442695, %v114_v24 }
 0x13a   :  { %157 = vpow2.f32 %v115_v25 }
 0x140   :  { %v158_v26 = vpop.eup %157 }
 0x141   :  { %117 = vadd.xlane.f32.xlu0 %v158_v26 }
 0x1b4   :  { %v118_v27 = vpop.xlane.xlu0 %117 }
 0x1b5   :  { %159 = vrcp.f32 %v118_v27 }
 0x1bb   :  { %v160_v28 = vpop.eup %159 }
 0x1bc   :  { %v120_v29 = vmul.f32 %v160_v28, %v158_v26 }
 0x1be   :  { %121 = vst [vmem:[#allocation2] sm:$0xff] %v120_v29 }
 0x1bf   :  { %132 = dma.vmem_to_hbm [thread:$0]  %s128_s1, 128, %s130_s23, [#allocation3]  }
 0x1c0   :  { %185 = dma.done.wait [#allocation3], 128  }
 0x1c1   :  { %186 = vsyncadd [#allocation3], 4294967168 }
 0x1c2   :  { %137 = vsyncpa [#allocation3], 1 }

</bundles_post_ra>
